<compile_context>
chip_gen: v7x
topology: tpu7x:2x2x1
jax: 0.10.0
libtpu: 0.0.40
codegen_flags: <defaults>
</compile_context>

<pallas_src>
import jax
import jax.numpy as jnp
from jax.experimental import pallas as pl
from jax.experimental.pallas import tpu as pltpu

IN_FEATURES = 13
HIDDEN = 64
OUT_FEATURES = 6
LANE = 128


def mlp_kernel(x_ref, w1_ref, b1_ref, w2_ref, b2_ref, o_ref):
    # x_ref : (tile, 13)  batch-major, exactly as the caller stores it (no copy)
    # w1_ref: (64, 13)    torch nn.Linear layout (out_features, in_features)
    # b1_ref: (64, 1)
    # w2_ref: (6, 64)
    # b2_ref: (6, 1)
    # o_ref : (6, tile)   feature-major -> full-lane (unmasked) stores
    x = x_ref[...]
    # h[o, b] = sum_i w1[o, i] * x[b, i]  -- contraction over the minor dim of both
    # operands (same dot_general pattern as q @ k^T); result is feature-major and
    # lane-dense so everything downstream stays lane-dense.
    h = jax.lax.dot_general(
        w1_ref[...], x,
        dimension_numbers=(((1,), (1,)), ((), ())),
        preferred_element_type=jnp.float32,
    ) + b1_ref[...]
    h = jnp.maximum(h, 0.0)                                         # ReLU on the VPU
    y = jnp.dot(w2_ref[...], h, preferred_element_type=jnp.float32) + b2_ref[...]
    o_ref[...] = y.astype(o_ref.dtype)


def openings_predictor_forward(x, w1, b1, w2, b2, *, tile_b=8192):
    """Forward pass.

    x  : (B, 13) float32 (torch module input convention)
    w1 : (64, 13), b1: (64,)   -- torch nn.Linear layout (out_features, in_features)
    w2 : (6, 64),  b2: (6,)
    returns (B, 6) float32
    """
    B = x.shape[0]

    # Batch tile: multiple of 128 lanes; capped at ceil(B/2) (rounded up to 128) so
    # large batches always produce >= 2 grid steps (v7x megacore sharding).
    half_r = pl.cdiv(pl.cdiv(B, 2), LANE) * LANE
    tile = min(int(tile_b), half_r)
    tile = max(LANE, pl.cdiv(tile, LANE) * LANE)
    grid = (pl.cdiv(B, tile),)

    b1c = b1.reshape(HIDDEN, 1).astype(jnp.float32)
    b2c = b2.reshape(OUT_FEATURES, 1).astype(jnp.float32)

    out_fm = pl.pallas_call(
        mlp_kernel,
        out_shape=jax.ShapeDtypeStruct((OUT_FEATURES, B), jnp.float32),
        grid_spec=pltpu.PrefetchScalarGridSpec(
            num_scalar_prefetch=0,
            grid=grid,
            in_specs=[
                pl.BlockSpec((tile, IN_FEATURES), lambda i: (i, 0)),       # x
                pl.BlockSpec((HIDDEN, IN_FEATURES), lambda i: (0, 0)),     # w1 (resident)
                pl.BlockSpec((HIDDEN, 1), lambda i: (0, 0)),               # b1 (resident)
                pl.BlockSpec((OUT_FEATURES, HIDDEN), lambda i: (0, 0)),    # w2 (resident)
                pl.BlockSpec((OUT_FEATURES, 1), lambda i: (0, 0)),         # b2 (resident)
            ],
            out_specs=pl.BlockSpec((OUT_FEATURES, tile), lambda i: (0, i)),
        ),
        compiler_params=pltpu.CompilerParams(
            dimension_semantics=("parallel",),      # batch tiles are independent
            vmem_limit_bytes=32 * 1024 * 1024,      # headroom for lane-padded x tiles
        ),
    )(x, w1, b1c, w2, b2c)

    # Small layout-only hop back to the torch (B, 6) convention (24 B/row each way).
    return out_fm.T


def init_params(key):
    """Deterministic init mirroring torch.nn.Linear default U[-1/sqrt(fan_in), 1/sqrt(fan_in)].

    Weights are kept in the torch layout (out_features, in_features)."""
    k1, k2, k3, k4 = jax.random.split(key, 4)
    bound1 = 1.0 / jnp.sqrt(float(IN_FEATURES))
    bound2 = 1.0 / jnp.sqrt(float(HIDDEN))
    w1 = jax.random.uniform(k1, (HIDDEN, IN_FEATURES), jnp.float32, -bound1, bound1)
    b1 = jax.random.uniform(k2, (HIDDEN,), jnp.float32, -bound1, bound1)
    w2 = jax.random.uniform(k3, (OUT_FEATURES, HIDDEN), jnp.float32, -bound2, bound2)
    b2 = jax.random.uniform(k4, (OUT_FEATURES,), jnp.float32, -bound2, bound2)
    return w1, b1, w2, b2


def reference_forward(x, w1, b1, w2, b2):
    h = jnp.maximum(x @ w1.T + b1[None, :], 0.0)
    return h @ w2.T + b2[None, :]


if __name__ == "__main__":
    key = jax.random.PRNGKey(0)
    kx, kp = jax.random.split(key)

    B = 16  # small batch; non-multiple of 128 is fine (partial blocks, masked writes)
    x = jax.random.normal(kx, (B, IN_FEATURES), jnp.float32)
    w1, b1, w2, b2 = init_params(kp)

    out = openings_predictor_forward(x, w1, b1, w2, b2)
    out = jax.block_until_ready(out)

    ref = reference_forward(x, w1, b1, w2, b2)
    assert out.shape == (B, OUT_FEATURES)
    assert jnp.allclose(out, ref, atol=1e-4, rtol=1e-4)

    print("KERNEL_OK")
</pallas_src>

<mosaic_0001>
module attributes {stable_mosaic.version = 11 : i64} {
  func.func @mlp_kernel(%arg0: i32, %arg1: memref<128x13xf32, #tpu.memory_space<vmem>>, %arg2: memref<64x13xf32, #tpu.memory_space<vmem>>, %arg3: memref<64x1xf32, #tpu.memory_space<vmem>>, %arg4: memref<6x64xf32, #tpu.memory_space<vmem>>, %arg5: memref<6x1xf32, #tpu.memory_space<vmem>>, %arg6: memref<6x128xf32, #tpu.memory_space<vmem>>) attributes {dimension_semantics = [#tpu.dimension_semantics<parallel>], iteration_bounds = array<i64: 1>, scalar_prefetch = 0 : i64, scratch_operands = 0 : i64, tpu.core_type = #tpu.core_type<tc>, window_params = [{transform_indices = @transform_0, window_bounds = array<i64: 128, 13>}, {pipeline_mode = #tpu.pipeline_mode<synchronous>, transform_indices = @transform_1, window_bounds = array<i64: 64, 13>}, {pipeline_mode = #tpu.pipeline_mode<synchronous>, transform_indices = @transform_2, window_bounds = array<i64: 64, 1>}, {pipeline_mode = #tpu.pipeline_mode<synchronous>, transform_indices = @transform_3, window_bounds = array<i64: 6, 64>}, {pipeline_mode = #tpu.pipeline_mode<synchronous>, transform_indices = @transform_4, window_bounds = array<i64: 6, 1>}, {transform_indices = @transform_5, window_bounds = array<i64: 6, 128>}]} {
    %c0 = arith.constant 0 : index
    %c0_0 = arith.constant 0 : index
    %0 = vector.load %arg1[%c0, %c0_0] : memref<128x13xf32, #tpu.memory_space<vmem>>, vector<128x13xf32>
    %c0_1 = arith.constant 0 : index
    %c0_2 = arith.constant 0 : index
    %1 = vector.load %arg2[%c0_1, %c0_2] : memref<64x13xf32, #tpu.memory_space<vmem>>, vector<64x13xf32>
    %cst = arith.constant dense<0.000000e+00> : vector<64x128xf32>
    %2 = tpu.matmul %1, %0, %cst {dimension_numbers = #tpu.dot_dimension_numbers<[1], [1], [0], [0], [0, 0, 1, 0], [], []>} : vector<64x13xf32>, vector<128x13xf32>, vector<64x128xf32> -> vector<64x128xf32>
    %c0_3 = arith.constant 0 : index
    %c0_4 = arith.constant 0 : index
    %3 = vector.load %arg3[%c0_3, %c0_4] : memref<64x1xf32, #tpu.memory_space<vmem>>, vector<64x1xf32>
    %4 = vector.broadcast %3 : vector<64x1xf32> to vector<64x128xf32>
    %5 = arith.addf %2, %4 : vector<64x128xf32>
    %cst_5 = arith.constant 0.000000e+00 : f32
    %6 = vector.broadcast %cst_5 : f32 to vector<64x128xf32>
    %7 = arith.maximumf %5, %6 : vector<64x128xf32>
    %c0_6 = arith.constant 0 : index
    %c0_7 = arith.constant 0 : index
    %8 = vector.load %arg4[%c0_6, %c0_7] : memref<6x64xf32, #tpu.memory_space<vmem>>, vector<6x64xf32>
    %cst_8 = arith.constant dense<0.000000e+00> : vector<6x128xf32>
    %9 = tpu.matmul %8, %7, %cst_8 {dimension_numbers = #tpu.dot_dimension_numbers<[1], [0], [0], [1], [0, 0, 1, 1], [], []>} : vector<6x64xf32>, vector<64x128xf32>, vector<6x128xf32> -> vector<6x128xf32>
    %c0_9 = arith.constant 0 : index
    %c0_10 = arith.constant 0 : index
    %10 = vector.load %arg5[%c0_9, %c0_10] : memref<6x1xf32, #tpu.memory_space<vmem>>, vector<6x1xf32>
    %11 = vector.broadcast %10 : vector<6x1xf32> to vector<6x128xf32>
    %12 = arith.addf %9, %11 : vector<6x128xf32>
    %c0_11 = arith.constant 0 : index
    %c0_12 = arith.constant 0 : index
    %13 = vector.load %arg6[%c0_11, %c0_12] : memref<6x128xf32, #tpu.memory_space<vmem>>, vector<6x128xf32>
    tpu.vector_store %arg6[%c0_11, %c0_12], %12 {strides = array<i32>} : memref<6x128xf32, #tpu.memory_space<vmem>>, vector<6x128xf32>,
    return
  }
  func.func @transform_0(%arg0: i32) -> (i32, i32) {
    %c0_i32 = arith.constant 0 : i32
    %c0_i32_0 = arith.constant 0 : i32
    return %arg0, %c0_i32 : i32, i32
  }
  func.func @transform_1(%arg0: i32) -> (i32, i32) {
    %c0_i32 = arith.constant 0 : i32
    %c0_i32_0 = arith.constant 0 : i32
    %c0_i32_1 = arith.constant 0 : i32
    return %c0_i32, %c0_i32_0 : i32, i32
  }
  func.func @transform_2(%arg0: i32) -> (i32, i32) {
    %c0_i32 = arith.constant 0 : i32
    %c0_i32_0 = arith.constant 0 : i32
    %c0_i32_1 = arith.constant 0 : i32
    return %c0_i32, %c0_i32_0 : i32, i32
  }
  func.func @transform_3(%arg0: i32) -> (i32, i32) {
    %c0_i32 = arith.constant 0 : i32
    %c0_i32_0 = arith.constant 0 : i32
    %c0_i32_1 = arith.constant 0 : i32
    return %c0_i32, %c0_i32_0 : i32, i32
  }
  func.func @transform_4(%arg0: i32) -> (i32, i32) {
    %c0_i32 = arith.constant 0 : i32
    %c0_i32_0 = arith.constant 0 : i32
    %c0_i32_1 = arith.constant 0 : i32
    return %c0_i32, %c0_i32_0 : i32, i32
  }
  func.func @transform_5(%arg0: i32) -> (i32, i32) {
    %c0_i32 = arith.constant 0 : i32
    %c0_i32_0 = arith.constant 0 : i32
    return %c0_i32, %arg0 : i32, i32
  }
}

</mosaic_0001>

<bundles_post_ra>
// kernel: tpu_custom_call.1
= control target key start
LH: loop header
LB: loop body
LE: loop exit
PB: predicated region body
PF: predicated region fallthrough
CT: control target
= control target key end

     0   :  { %vm93_vm0 = vcmask 105472   ;;  %v587_v6 = vmov 0   ;;  %s782_s0 = inlined_call_operand.vmem [shape: f32[16,13], index: 0, kind: input, shape index: {}]   ;;  %s783_s1 = inlined_call_operand.vmem [shape: f32[64,13], index: 1, kind: input, shape index: {}]   ;;  %s784_s2 = inlined_call_operand.vmem [shape: f32[64,1], index: 2, kind: input, shape index: {}]   ;;  %s785_s3 = inlined_call_operand.vmem [shape: f32[6,64], index: 3, kind: input, shape index: {}]   ;;  %s786_s4 = inlined_call_operand.vmem [shape: f32[6,1], index: 4, kind: input, shape index: {}]   ;;  %s787_s5 = inlined_call_operand.hbm [shape: f32[6,16], index: 5, kind: output, shape index: {}]  }
   0x1   :  { %v21_v0 = vld [vmem:[%s782_s0] sm:$0xff]  ;;  %v22_v1 = vld [vmem:[%s782_s0 + $0x8] sm:$0xff]  ;;  %v23_v2 = vld [vmem:[%s782_s0 + $0x10] sm:$0xff]  ;;  %561 = vset.pattern.permute.xlu0 %v587_v6  ;;  %562 = vset.pattern.permute.xlu1 %v587_v6 }
   0x2   :  { %v496_v3 = vpack.c.bf16 %v22_v1, %v21_v0  ;;  %vm633_vm1 = vmpackc.low %vm93_vm0, %vm93_vm0  ;;  %v24_v5 = vld [vmem:[%s782_s0 + $0x18] sm:$0xff]  ;;  %v37_v8 = vld [vmem:[%s783_s1] sm:$0xff] }
   0x3   :  { %v502_v7 = vpack.c.bf16 %v24_v5, %v23_v2  ;;  %v25_v9 = vld [vmem:[%s782_s0 + $0x20] sm:$0xff]  ;;  %v26_v10 = vld [vmem:[%s782_s0 + $0x28] sm:$0xff]  ;;  %465 = vmatprep.mubr.msk.f32.mxu0 %vm93_vm0, %v37_v8  ;;  %v47_v13 = vld [vmem:[%s784_s2 + $0x10] sm:$0xff] }
   0x4   :  { %498 = vmatprep.subr.msk.bf16.mxu0 %vm633_vm1, %v496_v3  ;;  %v45_v11 = vld [vmem:[%s784_s2] sm:$0xff]  ;;  %v508_v12 = vpack.c.bf16 %v26_v10, %v25_v9  ;;  %v46_v14 = vld [vmem:[%s784_s2 + $0x8] sm:$0xff]  ;;  %65 = vperm.xlu1 %562, %v47_v13   ;;  %v48_v15 = vld [vmem:[%s784_s2 + $0x18] sm:$0xff] }
   0x5   :  { %501 = vmatpush3.bf16.xpose.msk.msra.mxu0 %vm633_vm1, %v496_v3  ;;  %55 = vperm.xlu0 %561, %v45_v11  }
   0x6   :  { %504 = vmatprep.subr.msk.bf16.mxu0 %vm633_vm1, %v502_v7 }
   0x7   :  { %10 = vsyncpa [#allocation3], 0  ;;  %v27_v16 = vld [vmem:[%s782_s0 + $0x30] sm:$0xff]  ;;  %v28_v17 = vld [vmem:[%s782_s0 + $0x38] sm:$0xff]  ;;  %v588_v43 = vmov 0.0|0.0   ;;  %vm589_vm2 = vmmov 0  }
   0x8   :  { %v49_v18 = vld [vmem:[%s784_s2 + $0x20] sm:$0xff]  ;;  %70 = vperm.xlu1 %562, %v48_v15   ;;  %v50_v19 = vld [vmem:[%s784_s2 + $0x28] sm:$0xff]  ;;  %v514_v20 = vpack.c.bf16 %v28_v17, %v27_v16  ;;  %v51_v21 = vld [vmem:[%s784_s2 + $0x30] sm:$0xff]  ;;  %544 = vmatprep.subr.bf16.mxu1 %v588_v43  ;;  %v590_v44 = vmov 0.0   ;;  %vm286_vm3 = vcmask 523264   ;;  %s591_s7 = smov [#allocation2]  }
   0x9   :  { %60 = vperm.xlu0 %561, %v46_v14   ;;  %v52_v22 = vld [vmem:[%s784_s2 + $0x38] sm:$0xff]  ;;  %v29_v23 = vld [vmem:[%s782_s0 + $0x40] sm:$0xff]  ;;  %v30_v24 = vld [vmem:[%s782_s0 + $0x48] sm:$0xff]  ;;  %493 = vmatprep.mubr.msk.f32.mxu1 %vm589_vm2, %v590_v44  ;;  %s367_s2 = sshll.u32 %s591_s7, 4  ;;  %s368_s2 = int_to_ptr.vmem [resolvable:$true] %s367_s2 }
   0xa   :  { %v280_v25 = vld [vmem:[%s786_s4] sm:$0x3f]  ;;  %v520_v26 = vpack.c.bf16 %v30_v24, %v29_v23  ;;  %v31_v27 = vld [vmem:[%s782_s0 + $0x50] sm:$0xff]  ;;  %v32_v28 = vld [vmem:[%s782_s0 + $0x58] sm:$0xff]  ;;  %s563_s8 = scalar_lea.vmem %s368_s2, 128  ;;  %p568_p1 = scmp.lt.s32.totalorder %s368_s2, %s368_s2 }
   0xb   :  { %v526_v29 = vpack.c.bf16 %v32_v28, %v31_v27  ;;  %v33_v30 = vld [vmem:[%s782_s0 + $0x60] sm:$0xff]  ;;  %v34_v31 = vld [vmem:[%s782_s0 + $0x68] sm:$0xff]  ;;  %v35_v33 = vld [vmem:[%s782_s0 + $0x70] sm:$0xff]  ;;  %p564_p0 = scmp.ne.s32.totalorder %s368_s2, %s563_s8  ;;  %p569_p2 = scmp.lt.s32.totalorder %s563_s8, %s563_s8 }
   0xc   :  { %80 = vperm.xlu1 %562, %v50_v19   ;;  %v532_v32 = vpack.c.bf16 %v34_v31, %v33_v30  ;;  %v36_v34 = vld [vmem:[%s782_s0 + $0x78] sm:$0xff]  ;;  %v38_v36 = vld [vmem:[%s783_s1 + $0x8] sm:$0xff]  ;;  %v39_v37 = vld [vmem:[%s783_s1 + $0x10] sm:$0xff] }
   0xd   :  { %507 = vmatpush3.bf16.xpose.msk.msra.mxu0 %vm633_vm1, %v502_v7  ;;  %75 = vperm.xlu0 %561, %v49_v18   ;;  %v538_v35 = vpack.c.bf16 %v36_v34, %v35_v33  ;;  %v40_v38 = vld [vmem:[%s783_s1 + $0x18] sm:$0xff]  ;;  %v41_v39 = vld [vmem:[%s783_s1 + $0x20] sm:$0xff]  ;;  %v42_v40 = vld [vmem:[%s783_s1 + $0x28] sm:$0xff]  ;;  %p570_p3 = por %p569_p2, %p568_p1 }
   0xe   :  { %510 = vmatprep.subr.msk.bf16.mxu0 %vm633_vm1, %v508_v12  ;;  %v43_v41 = vld [vmem:[%s783_s1 + $0x30] sm:$0xff]  ;;  %v44_v42 = vld [vmem:[%s783_s1 + $0x38] sm:$0xff]  ;;  %v279_v17 = vld [vmem:[%s785_s3] sm:$0x3f] }
   0xf   :  { %p571_p4 = pnand %p570_p3, %p564_p0 }
  0x10   :  { %90 = vperm.xlu1 %562, %v52_v22  }
  0x11   :  { %85 = vperm.xlu0 %561, %v51_v21  }
  0x15   :  { %513 = vmatpush3.bf16.xpose.msk.msra.mxu0 %vm633_vm1, %v508_v12  ;;  %283 = vperm.xlu0 %561, %v280_v25  }
  0x16   :  { %516 = vmatprep.subr.msk.bf16.mxu0 %vm633_vm1, %v514_v20 }
  0x1d   :  { %519 = vmatpush3.bf16.xpose.msk.msra.mxu0 %vm633_vm1, %v514_v20 }
  0x1e   :  { %522 = vmatprep.subr.msk.bf16.mxu0 %vm633_vm1, %v520_v26 }
  0x25   :  { %525 = vmatpush3.bf16.xpose.msk.msra.mxu0 %vm633_vm1, %v520_v26 }
  0x26   :  { %528 = vmatprep.subr.msk.bf16.mxu0 %vm633_vm1, %v526_v29 }
  0x2d   :  { %531 = vmatpush3.bf16.xpose.msk.msra.mxu0 %vm633_vm1, %v526_v29 }
  0x2e   :  { %534 = vmatprep.subr.msk.bf16.mxu0 %vm633_vm1, %v532_v32 }
  0x35   :  { %537 = vmatpush3.bf16.xpose.msk.msra.mxu0 %vm633_vm1, %v532_v32 }
  0x36   :  { %540 = vmatprep.subr.msk.bf16.mxu0 %vm633_vm1, %v538_v35 }
  0x3d   :  { %543 = vmatpush3.bf16.xpose.msk.msra.mxu0 %vm633_vm1, %v538_v35 }
  0x44   :  { %466 = vmatmul.mubr.msk.f32.vlgmr.msra.gmra.mrb[0].mxu0 %vm93_vm0, %v38_v36 }
  0x45   :  { %468 = vmatprep.mubr.msk.f32.mxu0 %vm93_vm0, %v39_v37 }
  0x48   :  { %469 = vmatmul.mubr.msk.f32.gmra.mrb[2].mxu0 %vm93_vm0, %v40_v38 }
  0x49   :  { %471 = vmatprep.mubr.msk.f32.mxu0 %vm93_vm0, %v41_v39 }
  0x4c   :  { %472 = vmatmul.mubr.msk.f32.gmra.mrb[4].mxu0 %vm93_vm0, %v42_v40 }
  0x4d   :  { %474 = vmatprep.mubr.msk.f32.mxu0 %vm93_vm0, %v43_v41 }
  0x50   :  { %475 = vmatmul.mubr.msk.f32.gmra.mrb[6].mxu0 %vm93_vm0, %v44_v42 }
  0x83   :  { %v66_v46 = vpop.permute.xlu1 %65 }
  0x84   :  { %v56_v45 = vpop.permute.xlu0 %55 }
  0x87   :  { %v71_v48 = vpop.permute.xlu1 %70 }
  0x88   :  { %v61_v47 = vpop.permute.xlu0 %60 }
  0x8b   :  { %v81_v58 = vpop.permute.xlu1 %80 }
  0x8c   :  { %v76_v61 = vpop.permute.xlu0 %75 }
  0x8f   :  { %v91_v6 = vpop.permute.xlu1 %90 }
  0x90   :  { %v86_v9 = vpop.permute.xlu0 %85 }
  0x94   :  { %v284_v18 = vpop.permute.xlu0 %283 }
 0x117   :  { %v467_v49 = vpop.f32.mrb[0].mxu0 }
 0x118   :  { %v238_v50 = vadd.f32 %v467_v49, %v61_v47  ;;  %v232_v51 = vpop.f32.mrb[1].mxu0 }
 0x119   :  { %v233_v52 = vadd.f32 %v232_v51, %v56_v45 }
 0x11a   :  { %v272_v53 = vmax.f32 %v238_v50, 0.0 }
 0x11b   :  { %v271_v54 = vmax.f32 %v233_v52, 0.0  ;;  %v470_v55 = vpop.f32.mrb[2].mxu0 }
 0x11c   :  { %v248_v56 = vadd.f32 %v470_v55, %v71_v48  ;;  %v242_v57 = vpop.f32.mrb[3].mxu0 }
 0x11d   :  { %v243_v59 = vadd.f32 %v242_v57, %v66_v46  ;;  %v545_v60 = vpack.c.bf16 %v272_v53, %v271_v54 }
 0x11e   :  { %v274_v62 = vmax.f32 %v248_v56, 0.0 }
 0x11f   :  { %v273_v63 = vmax.f32 %v243_v59, 0.0  ;;  %v473_v0 = vpop.f32.mrb[4].mxu0  ;;  %546 = vmatpush3.bf16.msra.mxu1 %v545_v60 }
 0x120   :  { %v258_v1 = vadd.f32 %v473_v0, %v81_v58  ;;  %v252_v2 = vpop.f32.mrb[5].mxu0  ;;  %547 = vmatprep.subr.bf16.mxu1 %v588_v43 }
 0x121   :  { %v548_v3 = vpack.c.bf16 %v274_v62, %v273_v63  ;;  %v253_v4 = vadd.f32 %v252_v2, %v76_v61 }
 0x122   :  { %v276_v5 = vmax.f32 %v258_v1, 0.0 }
 0x123   :  { %v275_v7 = vmax.f32 %v253_v4, 0.0  ;;  %v476_v8 = vpop.f32.mrb[6].mxu0  ;;  %549 = vmatpush3.bf16.msra.mxu1 %v548_v3 }
 0x124   :  { %v268_v10 = vadd.f32 %v476_v8, %v91_v6  ;;  %v262_v11 = vpop.f32.mrb[7].mxu0  ;;  %550 = vmatprep.subr.bf16.mxu1 %v588_v43 }
 0x125   :  { %v551_v12 = vpack.c.bf16 %v276_v5, %v275_v7  ;;  %v263_v13 = vadd.f32 %v262_v11, %v86_v9 }
 0x126   :  { %v278_v14 = vmax.f32 %v268_v10, 0.0 }
 0x127   :  { %v277_v15 = vmax.f32 %v263_v13, 0.0  ;;  %552 = vmatpush3.bf16.msra.mxu1 %v551_v12 }
 0x128   :  { %553 = vmatprep.subr.bf16.mxu1 %v588_v43 }
 0x129   :  { %v554_v16 = vpack.c.bf16 %v278_v14, %v277_v15 }
 0x12b   :  { %555 = vmatpush3.bf16.msra.mxu1 %v554_v16 }
 0x12e   :  { %494 = vmatmul.mubr.msk.f32.vlgmr.msra.gmra.mrb[0].mxu1 %vm286_vm3, %v279_v17 }
 0x201   :  { %v356_v19 = vpop.f32.mrb[0].mxu1 }
 0x202   :  { %v357_v20 = vadd.f32 %v356_v19, %v284_v18  ;;  %v495_v21 = vpop.f32.mrb[1].mxu1 }
 0x204   :  { %360 = vst [vmem:[#allocation2] sm:$0x3f] %v357_v20 }
 0x205   :  { %574 = shalt.err (!%p571_p4)
}
 0x206   :  { %s575_s3 = scalar_lea.hbm %s787_s5, 128 }
 0x207   :  { %p576_p5 = scmp.ne.s32.totalorder %s787_s5, %s575_s3  ;;  %p579_p6 = scmp.lt.u32.totalorder %s575_s3, %s787_s5 }
 0x209   :  { %p581_p7 = pnand %p579_p6, %p576_p5 }
 0x20b   :  { %584 = shalt.err (!%p581_p7)
}
 0x20c   :  { %370 = dma.vmem_to_hbm [thread:$0]  %s368_s2, 128, %s787_s5, [#allocation3]  }
 0x20d   :  { %585 = dma.done.wait [#allocation3], 128  }
 0x20e   :  { %586 = vsyncadd [#allocation3], 4294967168 }
 0x20f   :  { %374 = vsyncpa [#allocation3], 1 }

</bundles_post_ra>
